<compile_context>
chip_gen: v5e
topology: v5e:2x2
jax: 0.10.0
libtpu: 0.0.40
codegen_flags: <defaults>
</compile_context>

<pallas_src>
import numpy as np
import jax
import jax.numpy as jnp
from jax.experimental import pallas as pl
from jax.experimental.pallas import tpu as pltpu


def _weighted_avg_kernel(b_ref, w_ref, x_ref, o_ref):
    # b_ref: (1,)         f32 conv bias in SMEM (frozen at 0.0 by the module)
    # w_ref: (1, C, 1)    f32 conv weights in VMEM (lane-broadcast)
    # x_ref: (TN, C, HWT) input slab in VMEM
    # o_ref: (TN, HWT)    output slab in VMEM (sublane/lane dense)
    x = x_ref[...].astype(jnp.float32)
    # Dense multiply (VPU) + channel sum on the sublane axis (XLU, otherwise
    # idle slot) -- no per-channel strided extracts / relayouts.
    acc = jnp.sum(x * w_ref[...], axis=1)
    o_ref[...] = jnp.maximum(acc + b_ref[0], 0.0).astype(o_ref.dtype)


def _round_up(v, m):
    return -(-v // m) * m


def _vmem_limit_bytes():
    """vmem_limit_bytes from the part's actual VMEM (v7x 64 MiB, v5e/v6e 128 MiB)."""
    cap = 64 << 20                      # assume the smallest per-core VMEM if the query fails
    try:
        info = pltpu.get_tpu_info()
        cap = int(getattr(info, "vmem_capacity_bytes", cap))
    except Exception:
        pass
    return max(32 << 20, min((cap * 3) // 4, 96 << 20))


def _step_vmem_bytes(tn, hwt, C, itemsize):
    """Live VMEM for one pipelined grid step (2-deep pipeline on every block)."""
    sub = max(8, 32 // itemsize)                                       # sublane packing unit
    in_buf = tn * _round_up(C, sub) * _round_up(hwt, 128) * itemsize   # (TN, C, HWT): C padded on sublanes
    w_buf = _round_up(C, 8) * 128 * 4                                  # (1, C, 1) f32 weight tile
    out_buf = _round_up(tn, 8) * _round_up(hwt, 128) * 4               # (TN, HWT) f32 output block
    return 2 * (in_buf + w_buf + out_buf)                              # double-buffered


def _choose_tiles(N, C, HW, itemsize, budget_bytes):
    """Pick (TN, HWT) for a 2-D (batch-tiles, spatial-tiles) grid.

    Grow HWT (contiguous HBM run length of every DMA descriptor) before TN,
    under one honest VMEM formula.  HWT is a multiple of 128 or the full
    extent; TN is a multiple of 8 or the full extent (second-to-last dim of the
    output block).  Non-dividing tiles use a cdiv grid with masked ragged edge
    blocks, so the budget always holds.
    """
    tn_min = N if N < 8 else 8

    def fits(tn, hwt):
        return _step_vmem_bytes(tn, hwt, C, itemsize) <= budget_bytes

    # --- spatial tile ---
    if fits(tn_min, HW):
        hwt = HW                                     # full extent: always layout-legal
    else:
        best_any, best_div = None, None
        m, hi = 128, _round_up(HW, 128)
        while m < hi and fits(tn_min, m):            # step cost is monotonic in m
            best_any = m
            if HW % m == 0:
                best_div = m
            m += 128
        if best_any is None:
            hwt = 128                                # pathological C; smallest legal tile
        elif best_div is not None and 2 * best_div >= best_any:
            hwt = best_div                           # prefer an exact divisor (no ragged edge)
        else:
            hwt = best_any
    # --- batch tile ---
    if fits(N, hwt):
        tn = N
    else:
        tn = tn_min
        while tn + 8 <= N and fits(tn + 8, hwt):
            tn += 8
    # --- megacore: if a big problem collapsed to a single grid step, split the
    #     spatial axis so both v7x TensorCores stream HBM ---
    if (pl.cdiv(N, tn) * pl.cdiv(HW, hwt) == 1
            and N * C * HW * itemsize >= (4 << 20) and HW % 256 == 0):
        hwt = HW // 2
    return tn, hwt


def weighted_average_forward(x, weights, bias=None):
    """x: (N, C, H, W) float, weights: (C,) float, bias: scalar (module freezes it
    at 0.0).  Returns relu(conv1x1(x; w, b)) with shape (N, 1, H, W), float32."""
    N, C, H, W = x.shape
    HW = H * W
    x_flat = x.reshape(N, C, HW)                     # contiguous -> free reshape
    w3d = jnp.asarray(weights, jnp.float32).reshape(1, C, 1)
    b1d = jnp.asarray(0.0 if bias is None else bias, jnp.float32).reshape(1)

    itemsize = jnp.dtype(x.dtype).itemsize
    vmem_limit = _vmem_limit_bytes()
    TN, HWT = _choose_tiles(N, C, HW, itemsize, vmem_limit - (8 << 20))

    out_flat = pl.pallas_call(
        _weighted_avg_kernel,
        out_shape=jax.ShapeDtypeStruct((N, HW), jnp.float32),
        grid_spec=pltpu.PrefetchScalarGridSpec(
            num_scalar_prefetch=0,
            grid=(pl.cdiv(N, TN), pl.cdiv(HW, HWT)),
            in_specs=[
                # Bias scalar lives in SMEM.
                pl.BlockSpec(memory_space=pltpu.MemorySpace.SMEM),
                # Tiny resident weight tile (same block every step).
                pl.BlockSpec((1, C, 1), lambda n, h: (0, 0, 0)),
                # Single streaming VMEM input: (TN, C, HWT) slabs, full-C blocks.
                pl.BlockSpec((TN, C, HWT), lambda n, h: (n, 0, h)),
            ],
            # Sublane/lane-dense output blocks (unmasked vector stores).
            out_specs=pl.BlockSpec((TN, HWT), lambda n, h: (n, h)),
        ),
        compiler_params=pltpu.CompilerParams(
            dimension_semantics=("parallel", "parallel"),
            vmem_limit_bytes=vmem_limit,
        ),
    )(b1d, w3d, x_flat)

    return out_flat.reshape(N, 1, H, W)


def make_weights(loss_rmse):
    """Replicates WeightedAverage.update_weights: w[c] = -loss/total + 2/C."""
    loss = np.asarray(loss_rmse, dtype=np.float64)
    total = loss.sum()
    w = -loss / total + 2.0 / len(loss)
    return jnp.asarray(w, dtype=jnp.float32)


if __name__ == "__main__":
    # C channels, each with an associated RMSE loss; 1x1 conv collapses channels
    # to 1 with frozen weights, bias frozen at 0, then ReLU.
    N, C, H, W = 2, 4, 16, 16
    loss_rmse = [0.5, 1.0, 1.5, 2.0]                 # len == C
    weights = make_weights(loss_rmse)                # (C,)

    key = jax.random.PRNGKey(0)
    x = jax.random.normal(key, (N, C, H, W), dtype=jnp.float32)

    out = weighted_average_forward(x, weights)
    out = jax.block_until_ready(out)

    # Reference in plain JAX (same math as Conv2d(k=1, bias=0) + ReLU).
    ref = jnp.maximum(jnp.einsum("nchw,c->nhw", x, weights)[:, None, :, :], 0.0)
    assert out.shape == (N, 1, H, W)
    np.testing.assert_allclose(np.asarray(out), np.asarray(ref),
                               rtol=1e-5, atol=1e-5)
    print("KERNEL_OK")
</pallas_src>

<mosaic_0001>
module attributes {stable_mosaic.version = 11 : i64} {
  func.func @_weighted_avg_kernel(%arg0: i32, %arg1: i32, %arg2: memref<1xf32, #tpu.memory_space<smem>>, %arg3: memref<1x4x1xf32, #tpu.memory_space<vmem>>, %arg4: memref<2x4x256xf32, #tpu.memory_space<vmem>>, %arg5: memref<2x256xf32, #tpu.memory_space<vmem>>) attributes {dimension_semantics = [#tpu.dimension_semantics<parallel>, #tpu.dimension_semantics<parallel>], iteration_bounds = array<i64: 1, 1>, scalar_prefetch = 0 : i64, scratch_operands = 0 : i64, tpu.core_type = #tpu.core_type<tc>, window_params = [{transform_indices = @transform_0, window_bounds = array<i64: 1>}, {pipeline_mode = #tpu.pipeline_mode<synchronous>, transform_indices = @transform_1, window_bounds = array<i64: 1, 4, 1>}, {transform_indices = @transform_2, window_bounds = array<i64: 2, 4, 256>}, {transform_indices = @transform_3, window_bounds = array<i64: 2, 256>}]} {
    %c0 = arith.constant 0 : index
    %c0_0 = arith.constant 0 : index
    %c0_1 = arith.constant 0 : index
    %0 = vector.load %arg4[%c0, %c0_0, %c0_1] : memref<2x4x256xf32, #tpu.memory_space<vmem>>, vector<2x4x256xf32>
    %c0_2 = arith.constant 0 : index
    %c0_3 = arith.constant 0 : index
    %c0_4 = arith.constant 0 : index
    %1 = vector.load %arg3[%c0_2, %c0_3, %c0_4] : memref<1x4x1xf32, #tpu.memory_space<vmem>>, vector<1x4x1xf32>
    %2 = vector.broadcast %1 : vector<1x4x1xf32> to vector<2x4x256xf32>
    %3 = arith.mulf %0, %2 : vector<2x4x256xf32>
    %cst = arith.constant dense<0.000000e+00> : vector<2x256xf32>
    %4 = vector.multi_reduction <add>, %3, %cst [1] : vector<2x4x256xf32> to vector<2x256xf32>
    %c0_5 = arith.constant 0 : index
    %5 = memref.load %arg2[%c0_5] : memref<1xf32, #tpu.memory_space<smem>>
    %6 = vector.broadcast %5 : f32 to vector<2x256xf32>
    %7 = arith.addf %4, %6 : vector<2x256xf32>
    %cst_6 = arith.constant 0.000000e+00 : f32
    %8 = vector.broadcast %cst_6 : f32 to vector<2x256xf32>
    %9 = arith.maximumf %7, %8 : vector<2x256xf32>
    %c0_7 = arith.constant 0 : index
    %c0_8 = arith.constant 0 : index
    %10 = vector.load %arg5[%c0_7, %c0_8] : memref<2x256xf32, #tpu.memory_space<vmem>>, vector<2x256xf32>
    tpu.vector_store %arg5[%c0_7, %c0_8], %9 {strides = array<i32>} : memref<2x256xf32, #tpu.memory_space<vmem>>, vector<2x256xf32>,
    return
  }
  func.func @transform_0(%arg0: i32, %arg1: i32) -> i32 {
    %c0_i32 = arith.constant 0 : i32
    %c0_i32_0 = arith.constant 0 : i32
    return %c0_i32 : i32
  }
  func.func @transform_1(%arg0: i32, %arg1: i32) -> (i32, i32, i32) {
    %c0_i32 = arith.constant 0 : i32
    %c0_i32_0 = arith.constant 0 : i32
    %c0_i32_1 = arith.constant 0 : i32
    %c0_i32_2 = arith.constant 0 : i32
    return %c0_i32, %c0_i32_0, %c0_i32_1 : i32, i32, i32
  }
  func.func @transform_2(%arg0: i32, %arg1: i32) -> (i32, i32, i32) {
    %c0_i32 = arith.constant 0 : i32
    %c0_i32_0 = arith.constant 0 : i32
    return %arg0, %c0_i32, %arg1 : i32, i32, i32
  }
  func.func @transform_3(%arg0: i32, %arg1: i32) -> (i32, i32) {
    %c0_i32 = arith.constant 0 : i32
    return %arg0, %arg1 : i32, i32
  }
}

</mosaic_0001>

<bundles_post_ra>
// kernel: tpu_custom_call.1
= control target key start
LH: loop header
LB: loop body
LE: loop exit
PB: predicated region body
PF: predicated region fallthrough
CT: control target
= control target key end

     0   :  { %9 = vsyncpa [#allocation4], 0  ;;  %s236_s0 = inlined_call_operand.<no memory space> [shape: f32[1], index: 0, kind: input, shape index: {}]   ;;  %s237_s1 = inlined_call_operand.vmem [shape: f32[1,4,1], index: 1, kind: input, shape index: {}]   ;;  %s238_s2 = inlined_call_operand.hbm [shape: f32[2,4,256], index: 2, kind: input, shape index: {}]   ;;  %s239_s3 = inlined_call_operand.hbm [shape: f32[2,256], index: 3, kind: output, shape index: {}]  }
   0x1   :  { %10 = vsyncpa [#allocation5], 0  ;;  %s19_s14 = sshll.u32 %s238_s2, 4  ;;  %s198_s15 = smov [#allocation3]   ;;  %s20_s14 = int_to_ptr.hbm [resolvable:$true] %s19_s14 }
   0x2   :  { %s21_s16 = sshll.u32 %s198_s15, 4  ;;  %s199_s17 = smov 128   ;;  %s22_s16 = int_to_ptr.vmem [resolvable:$true] %s21_s16 }
   0x3   :  { %s200_s18 = smov 8  }
   0x4   :  { %27 = dma.hbm_to_vmem [thread:$0]  %s20_s14, 256, %s22_s16, [#allocation4], %s199_s17, %s199_s17, %s200_s18  }
   0x5   :  { %194 = dma.done.wait [#allocation4], 256  }
   0x6   :  { %195 = vsyncadd [#allocation4], 4294967040  ;;  %v201_v0 = vmov 0   ;;  %v34_v1 = vld [vmem:[%s237_s1] sm:$0xf]  ;;  %v32_v6 = vld [vmem:[#allocation3] sm:$0xff]  ;;  %v89_v39 = vstv %s236_s0 }
   0x7   :  { %145 = vset.pattern.permute.xlu0 %v201_v0  ;;  %v202_v2 = vmov 839922192   ;;  %v33_v7 = vld [vmem:[#allocation3 + $0x8] sm:$0xff]  ;;  %vm59_vm0 = vcmask 1043456   ;;  %vm104_vm1 = vcmask 1041408   ;;  %vm112_vm2 = vcmask 1041409  }
   0x8   :  { %37 = vperm.xlu0 %145, %v34_v1   ;;  %v40_v3 = vunpack.c.l.s4 %v202_v2  ;;  %vm114_vm3 = vcmask 1043459   ;;  %vm116_vm4 = vcmask 1045509   ;;  %s203_s0 = smov [#allocation6]   ;;  %s129_s24 = sshll.u32 %s239_s3, 4  ;;  %vm118_vm5 = vcmask 1047559   ;;  %s130_s24 = int_to_ptr.hbm [resolvable:$true] %s129_s24 }
   0x9   :  { %s127_s21 = sshll.u32 %s203_s0, 4  ;;  %s128_s21 = int_to_ptr.vmem [resolvable:$true] %s127_s21 }
   0xa   :  { %v41_v4 = vunpack.c.0.s8 %v40_v3 }
  0x7a   :  { %v38_v5 = vpop.permute.xlu0 %37 }
  0x7b   :  { %v42_v8 = vperm.slane %v38_v5, %v41_v4 }
  0x7d   :  { %v44_v9 = vmul.f32 %v42_v8, %v32_v6  ;;  %v45_v10 = vmul.f32 %v42_v8, %v33_v7 }
  0x7f   :  { %48 = vst [vmem:[#allocation1] ss:$2 sm:$0xff] %v44_v9 }
  0x80   :  { %52 = vst [vmem:[#allocation1 + $0x10] ss:$2 sm:$0xff] %v45_v10 }
  0x86   :  { %v49_v11 = vld.sshfl [vmem:[#allocation1] sm:$0xff pattern:$0x75316420]  ;;  %v50_v12 = vld.sshfl [vmem:[#allocation1 + $0x8] sm:$0xff pattern:$0x75316420] }
  0x87   :  { %v53_v13 = vld.sshfl [vmem:[#allocation1 + $0x10] sm:$0xff pattern:$0x75316420]  ;;  %v54_v14 = vld.sshfl [vmem:[#allocation1 + $0x18] sm:$0xff pattern:$0x75316420] }
  0x88   :  { %v60_v15 = vsel %vm59_vm0, %v49_v11, 0.0  ;;  %v67_v16 = vsel %vm59_vm0, %v50_v12, 0.0  ;;  %v74_v17 = vsel %vm59_vm0, %v53_v13, 0.0  ;;  %v81_v18 = vsel %vm59_vm0, %v54_v14, 0.0 }
  0x89   :  { %v61_v19 = vrot.slane %v60_v15, 4  ;;  %v68_v20 = vrot.slane %v67_v16, 4  ;;  %v75_v21 = vrot.slane %v74_v17, 4  ;;  %v82_v22 = vrot.slane %v81_v18, 4 }
  0x8b   :  { %v62_v23 = vadd.f32 %v61_v19, %v60_v15  ;;  %v69_v24 = vadd.f32 %v68_v20, %v67_v16  ;;  %v76_v25 = vadd.f32 %v75_v21, %v74_v17  ;;  %v83_v26 = vadd.f32 %v82_v22, %v81_v18 }
  0x8d   :  { %v63_v27 = vrot.slane %v62_v23, 2  ;;  %v70_v28 = vrot.slane %v69_v24, 2  ;;  %v77_v29 = vrot.slane %v76_v25, 2  ;;  %v84_v30 = vrot.slane %v83_v26, 2 }
  0x8f   :  { %v64_v31 = vadd.f32 %v63_v27, %v62_v23  ;;  %v71_v32 = vadd.f32 %v70_v28, %v69_v24  ;;  %v78_v33 = vadd.f32 %v77_v29, %v76_v25  ;;  %v85_v34 = vadd.f32 %v84_v30, %v83_v26 }
  0x91   :  { %v65_v35 = vrot.slane %v64_v31, 1  ;;  %v72_v36 = vrot.slane %v71_v32, 1  ;;  %v79_v37 = vrot.slane %v78_v33, 1  ;;  %v86_v38 = vrot.slane %v85_v34, 1 }
  0x93   :  { %v66_v40 = vadd.f32 %v65_v35, %v64_v31  ;;  %v73_v41 = vadd.f32 %v72_v36, %v71_v32  ;;  %v80_v42 = vadd.f32 %v79_v37, %v78_v33  ;;  %v87_v43 = vadd.f32 %v86_v38, %v85_v34 }
  0x95   :  { %v91_v44 = vadd.f32 %v89_v39, %v73_v41  ;;  %v92_v45 = vadd.f32 %v89_v39, %v80_v42  ;;  %v93_v46 = vadd.f32 %v89_v39, %v87_v43  ;;  %v90_v47 = vadd.f32 %v89_v39, %v66_v40 }
  0x97   :  { %v95_v48 = vmax.f32 %v91_v44, 0.0  ;;  %v97_v49 = vmax.f32 %v93_v46, 0.0  ;;  %v96_v50 = vmax.f32 %v92_v45, 0.0  ;;  %v94_v53 = vmax.f32 %v90_v47, 0.0 }
  0x99   :  { %v102_v51 = vrot.slane %v95_v48, 6  ;;  %v103_v52 = vrot.slane %v97_v49, 6 }
  0x9b   :  { %v106_v54 = vsel %vm104_vm1, %v96_v50, %v103_v52  ;;  %v105_v56 = vsel %vm104_vm1, %v94_v53, %v102_v51 }
  0x9c   :  { %v111_v55 = vrot.slane %v106_v54, 7 }
  0x9e   :  { %v113_v57 = vsel %vm112_vm2, %v111_v55, %v105_v56 }
  0x9f   :  { %v115_v58 = vsel %vm114_vm3, %v111_v55, %v113_v57 }
  0xa0   :  { %v117_v59 = vsel %vm116_vm4, %v111_v55, %v115_v58 }
  0xa1   :  { %v119_v60 = vsel %vm118_vm5, %v111_v55, %v117_v59 }
  0xa2   :  { %121 = vst [vmem:[#allocation6] sm:$0xf] %v119_v60 }
  0xa3   :  { %132 = dma.vmem_to_hbm [thread:$0]  %s128_s21, 64, %s130_s24, [#allocation5]  }
  0xa4   :  { %196 = dma.done.wait [#allocation5], 64  }
  0xa5   :  { %197 = vsyncadd [#allocation5], 4294967232 }
  0xa6   :  { %137 = vsyncpa [#allocation4], 1 }
  0xa7   :  { %138 = vsyncpa [#allocation5], 1 }

</bundles_post_ra>
